<compile_context>
chip_gen: v5e
topology: v5e:2x2
jax: 0.10.0
libtpu: 0.0.40
codegen_flags: <defaults>
</compile_context>

<pallas_src>
import functools

import jax
import jax.numpy as jnp
from jax import lax
from jax.experimental import pallas as pl
from jax.experimental.pallas import tpu as pltpu

BN_EPS = 1e-5  # torch.nn.BatchNorm2d default eps


def _vmem_limit(bytes_needed):
    # Clamp to 48 MiB: leaves headroom on v7x (64 MiB physical), harmless on v5e/v6e.
    return int(min(max(bytes_needed, 32 << 20), 48 << 20))


# ---------------------------------------------------------------------------
# Kernel 1: separable pooling (stride folded) + fused per-channel BN partials.
# Grid = (N, C // tc); both axes "parallel".
# ---------------------------------------------------------------------------
def _make_pool_stats_kernel(*, k, s, p, H, W, Ho, Wo, pool_type, use_pad_scratch):
    Hp, Wp = H + 2 * p, W + 2 * p
    Ho1, Wo1 = Hp - k + 1, Wp - k + 1          # stride-1 pooled extents
    is_avg = pool_type == "avg"
    # avg: zero padding + valid-count divisor == count_include_pad=False.
    # max: finite lowest (not -inf) so any later arithmetic stays NaN-free.
    pad_val = 0.0 if is_avg else float(jnp.finfo(jnp.float32).min)

    def kernel(*args):
        if is_avg:
            inv_ref, x_ref = args[0], args[1]
            rest = args[2:]
        else:
            x_ref = args[0]
            rest = args[1:]
        pooled_ref, psum_ref, psq_ref = rest[0], rest[1], rest[2]
        pad_ref = rest[3] if use_pad_scratch else None

        tc = x_ref.shape[1]
        x = x_ref[0].astype(jnp.float32)                      # (tc, H, W)

        if use_pad_scratch:
            # Padding lives only in a VMEM scratch ref (never in HBM, no concat).
            pad_ref[...] = jnp.full((tc, Hp, Wp), pad_val, jnp.float32)
            pad_ref[:, p:p + H, p:p + W] = x

            def wtap(dj):
                return pad_ref[:, :, dj:dj + Wo1]
        else:
            def wtap(dj):
                return x[:, :, dj:dj + Wo1]

        # ---- stage 1: pooling along W (lane axis), stride-1, k shifted taps ----
        w1 = wtap(0)
        for dj in range(1, k):
            t = wtap(dj)
            w1 = (w1 + t) if is_avg else jnp.maximum(w1, t)   # (tc, Hp, Wo1)

        # ---- fold W stride: exact in-kernel column subsample (static slices) ----
        if s > 1:
            w1 = jnp.concatenate(
                [w1[:, :, j * s:j * s + 1] for j in range(Wo)], axis=2)  # (tc, Hp, Wo)

        # ---- stage 2: pooling along H (sublane axis), stride-1, k shifted taps ----
        h1 = w1[:, 0:Ho1, :]
        for di in range(1, k):
            t = w1[:, di:di + Ho1, :]
            h1 = (h1 + t) if is_avg else jnp.maximum(h1, t)   # (tc, Ho1, Wo)

        # ---- fold H stride: exact in-kernel row subsample ----
        if s > 1:
            h1 = jnp.concatenate(
                [h1[:, i * s:i * s + 1, :] for i in range(Ho)], axis=1)  # (tc, Ho, Wo)

        if is_avg:
            pooled = h1 * inv_ref[...]        # (Ho, Wo) valid-count divisor, bcast over tc
        else:
            pooled = h1

        pooled_ref[0] = pooled.astype(pooled_ref.dtype)

        # Fused BN partial statistics (lane reduce, then sublane reduce).
        ssum = jnp.sum(jnp.sum(pooled, axis=2, keepdims=True), axis=1, keepdims=True)
        ssq = jnp.sum(jnp.sum(pooled * pooled, axis=2, keepdims=True), axis=1, keepdims=True)
        psum_ref[0] = ssum
        psq_ref[0] = ssq

    return kernel


def _pool_with_stats(x, inv_cnt, *, kernel_size, stride, padding, pool_type):
    N, C, H, W = x.shape
    k, s, p = kernel_size, stride, padding
    Ho = (H + 2 * p - k) // s + 1
    Wo = (W + 2 * p - k) // s + 1
    Hp, Wp = H + 2 * p, W + 2 * p

    is_avg = pool_type == "avg"
    use_pad_scratch = p > 0

    # Channel tile: largest divisor of C that keeps the per-step working set
    # (double-buffered input block + padded scratch + pooling temporaries) small.
    per_ch = 2 * H * W * x.dtype.itemsize + 5 * Hp * Wp * 4
    tc = 1
    for d in range(1, C + 1):
        if C % d == 0 and d * per_ch <= (6 << 20):
            tc = d

    kernel = _make_pool_stats_kernel(
        k=k, s=s, p=p, H=H, W=W, Ho=Ho, Wo=Wo,
        pool_type=pool_type, use_pad_scratch=use_pad_scratch)

    in_specs = [pl.BlockSpec((1, tc, H, W), lambda n, c: (n, c, 0, 0))]
    inputs = [x]
    if is_avg:
        # Valid-count table only exists (and is DMA'd) for the avg path.
        in_specs = [pl.BlockSpec((Ho, Wo), lambda n, c: (0, 0))] + in_specs
        inputs = [inv_cnt] + inputs

    scratch_shapes = []
    if use_pad_scratch:
        scratch_shapes.append(pltpu.VMEM((tc, Hp, Wp), jnp.float32))

    blk_bytes = (tc * H * W * x.dtype.itemsize
                 + (Ho * Wo * 4 if is_avg else 0)
                 + tc * Ho * Wo * 4 + 2 * tc * 4)
    need = 4 * blk_bytes + 5 * tc * Hp * Wp * 4 + (2 << 20)   # blocks x2 bufs + scratch/temps

    return pl.pallas_call(
        kernel,
        out_shape=(
            jax.ShapeDtypeStruct((N, C, Ho, Wo), jnp.float32),
            jax.ShapeDtypeStruct((N, C, 1, 1), jnp.float32),
            jax.ShapeDtypeStruct((N, C, 1, 1), jnp.float32),
        ),
        grid=(N, C // tc),
        in_specs=in_specs,
        out_specs=(
            pl.BlockSpec((1, tc, Ho, Wo), lambda n, c: (n, c, 0, 0)),
            pl.BlockSpec((1, tc, 1, 1), lambda n, c: (n, c, 0, 0)),
            pl.BlockSpec((1, tc, 1, 1), lambda n, c: (n, c, 0, 0)),
        ),
        scratch_shapes=scratch_shapes,
        compiler_params=pltpu.CompilerParams(
            dimension_semantics=("parallel", "parallel"),
            vmem_limit_bytes=_vmem_limit(need),
        ),
    )(*inputs)


# ---------------------------------------------------------------------------
# Kernel 2: BN apply, y = x * scale[row] + shift[row], on lane-dense (N*C, Ho*Wo).
# ---------------------------------------------------------------------------
def _scale_shift_kernel(x_ref, a_ref, b_ref, o_ref):
    o_ref[...] = x_ref[...] * a_ref[...] + b_ref[...]


def _pick_tile(dim, candidates):
    for t in candidates:
        if dim >= t and dim % t == 0:
            return t
    return dim  # full extent (always legal)


def _scale_shift(x2d, a2d, b2d):
    R, L = x2d.shape
    tr = _pick_tile(R, (512, 256, 128, 64, 32, 16, 8))
    tl = _pick_tile(L, (2048, 1024, 512, 256, 128))
    grid = (R // tr, L // tl)
    need = 2 * (2 * tr * tl * 4 + 2 * tr * 4 + tr * tl * 4) + (2 << 20)
    return pl.pallas_call(
        _scale_shift_kernel,
        out_shape=jax.ShapeDtypeStruct((R, L), jnp.float32),
        grid=grid,
        in_specs=[
            pl.BlockSpec((tr, tl), lambda i, j: (i, j)),
            pl.BlockSpec((tr, 1), lambda i, j: (i, 0)),
            pl.BlockSpec((tr, 1), lambda i, j: (i, 0)),
        ],
        out_specs=pl.BlockSpec((tr, tl), lambda i, j: (i, j)),
        compiler_params=pltpu.CompilerParams(
            dimension_semantics=("parallel", "parallel"),
            vmem_limit_bytes=_vmem_limit(need),
        ),
    )(x2d, a2d, b2d)


# ---------------------------------------------------------------------------
# PoolBN forward (wrapper = layout plumbing + tiny per-channel math only).
# ---------------------------------------------------------------------------
def pool_bn_forward(x, gamma, beta, *, pool_type, kernel_size, stride, padding,
                    eps=BN_EPS):
    pool_type = pool_type.lower()
    assert pool_type in ("max", "avg")
    N, C, H, W = x.shape
    k, s, p = kernel_size, stride, padding
    Ho = (H + 2 * p - k) // s + 1
    Wo = (W + 2 * p - k) // s + 1

    if gamma is None:   # affine=False
        gamma = jnp.ones((C,), jnp.float32)
    if beta is None:
        beta = jnp.zeros((C,), jnp.float32)

    if pool_type == "avg":
        # 1 / (# window taps inside the un-padded input) on the STRIDED output grid
        # == AvgPool2d(count_include_pad=False) divisor.
        hs = jnp.arange(Ho) * s - p
        ws = jnp.arange(Wo) * s - p
        hv = jnp.minimum(hs + k, H) - jnp.maximum(hs, 0)
        wv = jnp.minimum(ws + k, W) - jnp.maximum(ws, 0)
        inv_cnt = 1.0 / jnp.maximum(hv[:, None] * wv[None, :], 1).astype(jnp.float32)
    else:
        inv_cnt = None

    pooled, psum, psq = _pool_with_stats(
        x, inv_cnt, kernel_size=k, stride=s, padding=p, pool_type=pool_type)

    # Finalize BN statistics (tiny per-channel math) and fold into scale/shift.
    tsum = jnp.sum(psum, axis=0).reshape(C)
    tsq = jnp.sum(psq, axis=0).reshape(C)
    m = float(N * Ho * Wo)
    mean = tsum / m
    var = jnp.maximum(tsq / m - mean * mean, 0.0)        # biased batch variance
    inv = lax.rsqrt(var + eps)
    scale = gamma.astype(jnp.float32) * inv
    shift = beta.astype(jnp.float32) - mean * scale

    x2d = pooled.reshape(N * C, Ho * Wo)                 # free contiguous reshape
    a2d = jnp.tile(scale, N).reshape(N * C, 1)           # row r = n*C + c -> scale[c]
    b2d = jnp.tile(shift, N).reshape(N * C, 1)
    out2d = _scale_shift(x2d, a2d, b2d)
    return out2d.reshape(N, C, Ho, Wo)


# ---------------------------------------------------------------------------
# Pure-JAX reference (independent: lax.reduce_window) for verification.
# ---------------------------------------------------------------------------
def reference_forward(x, gamma, beta, *, pool_type, kernel_size, stride, padding,
                      eps=BN_EPS):
    k, s, p = kernel_size, stride, padding
    x = x.astype(jnp.float32)
    dims, strides = (1, 1, k, k), (1, 1, s, s)
    pads = [(0, 0), (0, 0), (p, p), (p, p)]
    if pool_type.lower() == "max":
        y = lax.reduce_window(x, -jnp.inf, lax.max, dims, strides, pads)
    else:
        ysum = lax.reduce_window(x, 0.0, lax.add, dims, strides, pads)
        cnt = lax.reduce_window(jnp.ones_like(x), 0.0, lax.add, dims, strides, pads)
        y = ysum / cnt                                   # count_include_pad=False
    mean = jnp.mean(y, axis=(0, 2, 3), keepdims=True)
    var = jnp.mean((y - mean) ** 2, axis=(0, 2, 3), keepdims=True)
    g = gamma.reshape(1, -1, 1, 1)
    b = beta.reshape(1, -1, 1, 1)
    return (y - mean) * lax.rsqrt(var + eps) * g + b


if __name__ == "__main__":
    # Small shapes consistent with the module: C=4, kernel_size=3, padding=1,
    # input x: (N=2, C=4, H=16, W=16) in NCHW like PyTorch.
    N, C, H, W = 2, 4, 16, 16
    k, p = 3, 1

    key = jax.random.PRNGKey(0)
    kx, kg, kb = jax.random.split(key, 3)
    x = jax.random.normal(kx, (N, C, H, W), jnp.float32)
    gamma = 1.0 + 0.1 * jax.random.normal(kg, (C,), jnp.float32)   # BN affine weight
    beta = 0.1 * jax.random.normal(kb, (C,), jnp.float32)          # BN affine bias

    for pool_type, stride in (("avg", 1), ("max", 1), ("avg", 2), ("max", 2)):
        fwd = jax.jit(functools.partial(
            pool_bn_forward, pool_type=pool_type,
            kernel_size=k, stride=stride, padding=p))
        out = jax.block_until_ready(fwd(x, gamma, beta))
        ref = reference_forward(x, gamma, beta, pool_type=pool_type,
                                kernel_size=k, stride=stride, padding=p)
        assert out.shape == ref.shape, (pool_type, stride, out.shape, ref.shape)
        max_err = float(jnp.max(jnp.abs(out - ref)))
        assert jnp.allclose(out, ref, atol=1e-4, rtol=1e-4), (pool_type, stride, max_err)

    print("KERNEL_OK")
</pallas_src>

<mosaic_0001>
module attributes {stable_mosaic.version = 11 : i64} {
  func.func @kernel(%arg0: i32, %arg1: i32, %arg2: memref<16x16xf32, #tpu.memory_space<vmem>>, %arg3: memref<1x4x16x16xf32, #tpu.memory_space<vmem>>, %arg4: memref<1x4x16x16xf32, #tpu.memory_space<vmem>>, %arg5: memref<1x4x1x1xf32, #tpu.memory_space<vmem>>, %arg6: memref<1x4x1x1xf32, #tpu.memory_space<vmem>>, %arg7: memref<4x18x18xf32, #tpu.memory_space<vmem>>) attributes {dimension_semantics = [#tpu.dimension_semantics<parallel>, #tpu.dimension_semantics<parallel>], iteration_bounds = array<i64: 2, 1>, scalar_prefetch = 0 : i64, scratch_operands = 1 : i64, tpu.core_type = #tpu.core_type<tc>, window_params = [{pipeline_mode = #tpu.pipeline_mode<synchronous>, transform_indices = @transform_0, window_bounds = array<i64: 16, 16>}, {transform_indices = @transform_1, window_bounds = array<i64: 1, 4, 16, 16>}, {transform_indices = @transform_2, window_bounds = array<i64: 1, 4, 16, 16>}, {transform_indices = @transform_3, window_bounds = array<i64: 1, 4, 1, 1>}, {transform_indices = @transform_4, window_bounds = array<i64: 1, 4, 1, 1>}]} {
    %c0 = arith.constant 0 : index
    %c0_0 = arith.constant 0 : index
    %c0_1 = arith.constant 0 : index
    %c0_2 = arith.constant 0 : index
    %0 = vector.load %arg3[%c0, %c0_0, %c0_1, %c0_2] : memref<1x4x16x16xf32, #tpu.memory_space<vmem>>, vector<1x4x16x16xf32>
    %1 = vector.shape_cast %0 : vector<1x4x16x16xf32> to vector<4x16x16xf32>
    %cst = arith.constant 0.000000e+00 : f32
    %2 = vector.broadcast %cst : f32 to vector<4x18x18xf32>
    %c0_3 = arith.constant 0 : index
    %c0_4 = arith.constant 0 : index
    %c0_5 = arith.constant 0 : index
    %3 = vector.load %arg7[%c0_3, %c0_4, %c0_5] : memref<4x18x18xf32, #tpu.memory_space<vmem>>, vector<4x18x18xf32>
    tpu.vector_store %arg7[%c0_3, %c0_4, %c0_5], %2 {strides = array<i32>} : memref<4x18x18xf32, #tpu.memory_space<vmem>>, vector<4x18x18xf32>,
    %c0_6 = arith.constant 0 : index
    %c1 = arith.constant 1 : index
    %c1_7 = arith.constant 1 : index
    %4 = vector.load %arg7[%c0_6, %c1, %c1_7] : memref<4x18x18xf32, #tpu.memory_space<vmem>>, vector<4x16x16xf32>
    tpu.vector_store %arg7[%c0_6, %c1, %c1_7], %1 {strides = array<i32>} : memref<4x18x18xf32, #tpu.memory_space<vmem>>, vector<4x16x16xf32>,
    %c0_8 = arith.constant 0 : index
    %c0_9 = arith.constant 0 : index
    %c0_10 = arith.constant 0 : index
    %5 = vector.load %arg7[%c0_8, %c0_9, %c0_10] : memref<4x18x18xf32, #tpu.memory_space<vmem>>, vector<4x18x16xf32>
    %c0_11 = arith.constant 0 : index
    %c0_12 = arith.constant 0 : index
    %c1_13 = arith.constant 1 : index
    %6 = vector.load %arg7[%c0_11, %c0_12, %c1_13] : memref<4x18x18xf32, #tpu.memory_space<vmem>>, vector<4x18x16xf32>
    %7 = arith.addf %5, %6 : vector<4x18x16xf32>
    %c0_14 = arith.constant 0 : index
    %c0_15 = arith.constant 0 : index
    %c2 = arith.constant 2 : index
    %8 = vector.load %arg7[%c0_14, %c0_15, %c2] : memref<4x18x18xf32, #tpu.memory_space<vmem>>, vector<4x18x16xf32>
    %9 = arith.addf %7, %8 : vector<4x18x16xf32>
    %10 = vector.extract_strided_slice %9 {offsets = [0, 0, 0], sizes = [4, 16, 16], strides = [1, 1, 1]} : vector<4x18x16xf32> to vector<4x16x16xf32>
    %11 = vector.extract_strided_slice %9 {offsets = [0, 1, 0], sizes = [4, 16, 16], strides = [1, 1, 1]} : vector<4x18x16xf32> to vector<4x16x16xf32>
    %12 = arith.addf %10, %11 : vector<4x16x16xf32>
    %13 = vector.extract_strided_slice %9 {offsets = [0, 2, 0], sizes = [4, 16, 16], strides = [1, 1, 1]} : vector<4x18x16xf32> to vector<4x16x16xf32>
    %14 = arith.addf %12, %13 : vector<4x16x16xf32>
    %c0_16 = arith.constant 0 : index
    %c0_17 = arith.constant 0 : index
    %15 = vector.load %arg2[%c0_16, %c0_17] : memref<16x16xf32, #tpu.memory_space<vmem>>, vector<16x16xf32>
    %16 = vector.shape_cast %15 : vector<16x16xf32> to vector<1x16x16xf32>
    %17 = vector.broadcast %16 : vector<1x16x16xf32> to vector<4x16x16xf32>
    %18 = arith.mulf %14, %17 : vector<4x16x16xf32>
    %c0_18 = arith.constant 0 : index
    %c0_19 = arith.constant 0 : index
    %c0_20 = arith.constant 0 : index
    %c0_21 = arith.constant 0 : index
    %19 = vector.load %arg4[%c0_18, %c0_19, %c0_20, %c0_21] : memref<1x4x16x16xf32, #tpu.memory_space<vmem>>, vector<1x4x16x16xf32>
    %20 = vector.shape_cast %19 : vector<1x4x16x16xf32> to vector<4x16x16xf32>
    %21 = vector.shape_cast %18 : vector<4x16x16xf32> to vector<1x4x16x16xf32>
    tpu.vector_store %arg4[%c0_18, %c0_19, %c0_20, %c0_21], %21 {strides = array<i32>} : memref<1x4x16x16xf32, #tpu.memory_space<vmem>>, vector<1x4x16x16xf32>,
    %cst_22 = arith.constant dense<0.000000e+00> : vector<4x16xf32>
    %22 = vector.multi_reduction <add>, %18, %cst_22 [2] : vector<4x16x16xf32> to vector<4x16xf32>
    %23 = vector.shape_cast %22 : vector<4x16xf32> to vector<4x16x1xf32>
    %cst_23 = arith.constant dense<0.000000e+00> : vector<4x1xf32>
    %24 = vector.multi_reduction <add>, %23, %cst_23 [1] : vector<4x16x1xf32> to vector<4x1xf32>
    %25 = vector.shape_cast %24 : vector<4x1xf32> to vector<4x1x1xf32>
    %26 = arith.mulf %18, %18 : vector<4x16x16xf32>
    %cst_24 = arith.constant dense<0.000000e+00> : vector<4x16xf32>
    %27 = vector.multi_reduction <add>, %26, %cst_24 [2] : vector<4x16x16xf32> to vector<4x16xf32>
    %28 = vector.shape_cast %27 : vector<4x16xf32> to vector<4x16x1xf32>
    %cst_25 = arith.constant dense<0.000000e+00> : vector<4x1xf32>
    %29 = vector.multi_reduction <add>, %28, %cst_25 [1] : vector<4x16x1xf32> to vector<4x1xf32>
    %30 = vector.shape_cast %29 : vector<4x1xf32> to vector<4x1x1xf32>
    %c0_26 = arith.constant 0 : index
    %c0_27 = arith.constant 0 : index
    %c0_28 = arith.constant 0 : index
    %c0_29 = arith.constant 0 : index
    %31 = vector.load %arg5[%c0_26, %c0_27, %c0_28, %c0_29] : memref<1x4x1x1xf32, #tpu.memory_space<vmem>>, vector<1x4x1x1xf32>
    %32 = vector.shape_cast %31 : vector<1x4x1x1xf32> to vector<4x1x1xf32>
    %33 = vector.shape_cast %25 : vector<4x1x1xf32> to vector<1x4x1x1xf32>
    tpu.vector_store %arg5[%c0_26, %c0_27, %c0_28, %c0_29], %33 {strides = array<i32>} : memref<1x4x1x1xf32, #tpu.memory_space<vmem>>, vector<1x4x1x1xf32>,
    %c0_30 = arith.constant 0 : index
    %c0_31 = arith.constant 0 : index
    %c0_32 = arith.constant 0 : index
    %c0_33 = arith.constant 0 : index
    %34 = vector.load %arg6[%c0_30, %c0_31, %c0_32, %c0_33] : memref<1x4x1x1xf32, #tpu.memory_space<vmem>>, vector<1x4x1x1xf32>
    %35 = vector.shape_cast %34 : vector<1x4x1x1xf32> to vector<4x1x1xf32>
    %36 = vector.shape_cast %30 : vector<4x1x1xf32> to vector<1x4x1x1xf32>
    tpu.vector_store %arg6[%c0_30, %c0_31, %c0_32, %c0_33], %36 {strides = array<i32>} : memref<1x4x1x1xf32, #tpu.memory_space<vmem>>, vector<1x4x1x1xf32>,
    return
  }
  func.func @transform_0(%arg0: i32, %arg1: i32) -> (i32, i32) {
    %c0_i32 = arith.constant 0 : i32
    %c0_i32_0 = arith.constant 0 : i32
    %c0_i32_1 = arith.constant 0 : i32
    return %c0_i32, %c0_i32_0 : i32, i32
  }
  func.func @transform_1(%arg0: i32, %arg1: i32) -> (i32, i32, i32, i32) {
    %c0_i32 = arith.constant 0 : i32
    %c0_i32_0 = arith.constant 0 : i32
    %c0_i32_1 = arith.constant 0 : i32
    return %arg0, %arg1, %c0_i32, %c0_i32_0 : i32, i32, i32, i32
  }
  func.func @transform_2(%arg0: i32, %arg1: i32) -> (i32, i32, i32, i32) {
    %c0_i32 = arith.constant 0 : i32
    %c0_i32_0 = arith.constant 0 : i32
    %c0_i32_1 = arith.constant 0 : i32
    return %arg0, %arg1, %c0_i32, %c0_i32_0 : i32, i32, i32, i32
  }
  func.func @transform_3(%arg0: i32, %arg1: i32) -> (i32, i32, i32, i32) {
    %c0_i32 = arith.constant 0 : i32
    %c0_i32_0 = arith.constant 0 : i32
    %c0_i32_1 = arith.constant 0 : i32
    return %arg0, %arg1, %c0_i32, %c0_i32_0 : i32, i32, i32, i32
  }
  func.func @transform_4(%arg0: i32, %arg1: i32) -> (i32, i32, i32, i32) {
    %c0_i32 = arith.constant 0 : i32
    %c0_i32_0 = arith.constant 0 : i32
    %c0_i32_1 = arith.constant 0 : i32
    return %arg0, %arg1, %c0_i32, %c0_i32_0 : i32, i32, i32, i32
  }
}

module attributes {stable_mosaic.version = 11 : i64} {
  func.func @_scale_shift_kernel(%arg0: i32, %arg1: i32, %arg2: memref<8x256xf32, #tpu.memory_space<vmem>>, %arg3: memref<8x1xf32, #tpu.memory_space<vmem>>, %arg4: memref<8x1xf32, #tpu.memory_space<vmem>>, %arg5: memref<8x256xf32, #tpu.memory_space<vmem>>) attributes {dimension_semantics = [#tpu.dimension_semantics<parallel>, #tpu.dimension_semantics<parallel>], iteration_bounds = array<i64: 1, 1>, scalar_prefetch = 0 : i64, scratch_operands = 0 : i64, tpu.core_type = #tpu.core_type<tc>, window_params = [{transform_indices = @transform_0, window_bounds = array<i64: 8, 256>}, {transform_indices = @transform_1, window_bounds = array<i64: 8, 1>}, {transform_indices = @transform_2, window_bounds = array<i64: 8, 1>}, {transform_indices = @transform_3, window_bounds = array<i64: 8, 256>}]} {
    %c0 = arith.constant 0 : index
    %c0_0 = arith.constant 0 : index
    %0 = vector.load %arg2[%c0, %c0_0] : memref<8x256xf32, #tpu.memory_space<vmem>>, vector<8x256xf32>
    %c0_1 = arith.constant 0 : index
    %c0_2 = arith.constant 0 : index
    %1 = vector.load %arg3[%c0_1, %c0_2] : memref<8x1xf32, #tpu.memory_space<vmem>>, vector<8x1xf32>
    %2 = vector.broadcast %1 : vector<8x1xf32> to vector<8x256xf32>
    %3 = arith.mulf %0, %2 : vector<8x256xf32>
    %c0_3 = arith.constant 0 : index
    %c0_4 = arith.constant 0 : index
    %4 = vector.load %arg4[%c0_3, %c0_4] : memref<8x1xf32, #tpu.memory_space<vmem>>, vector<8x1xf32>
    %5 = vector.broadcast %4 : vector<8x1xf32> to vector<8x256xf32>
    %6 = arith.addf %3, %5 : vector<8x256xf32>
    %c0_5 = arith.constant 0 : index
    %c0_6 = arith.constant 0 : index
    %7 = vector.load %arg5[%c0_5, %c0_6] : memref<8x256xf32, #tpu.memory_space<vmem>>, vector<8x256xf32>
    tpu.vector_store %arg5[%c0_5, %c0_6], %6 {strides = array<i32>} : memref<8x256xf32, #tpu.memory_space<vmem>>, vector<8x256xf32>,
    return
  }
  func.func @transform_0(%arg0: i32, %arg1: i32) -> (i32, i32) {
    %c0_i32 = arith.constant 0 : i32
    return %arg0, %arg1 : i32, i32
  }
  func.func @transform_1(%arg0: i32, %arg1: i32) -> (i32, i32) {
    %c0_i32 = arith.constant 0 : i32
    %c0_i32_0 = arith.constant 0 : i32
    return %arg0, %c0_i32 : i32, i32
  }
  func.func @transform_2(%arg0: i32, %arg1: i32) -> (i32, i32) {
    %c0_i32 = arith.constant 0 : i32
    %c0_i32_0 = arith.constant 0 : i32
    return %arg0, %c0_i32 : i32, i32
  }
  func.func @transform_3(%arg0: i32, %arg1: i32) -> (i32, i32) {
    %c0_i32 = arith.constant 0 : i32
    return %arg0, %arg1 : i32, i32
  }
}

</mosaic_0001>

<bundles_post_ra>
// kernel: tile.18
= control target key start
LH: loop header
LB: loop body
LE: loop exit
PB: predicated region body
PF: predicated region fallthrough
CT: control target
= control target key end

     0   :  { %s22_s0 = inlined_call_operand.vmem [shape: f32[4], index: 0, kind: input, shape index: {}]   ;;  %s23_s1 = inlined_call_operand.vmem [shape: f32[2,4], index: 1, kind: output, shape index: {}]  }
   0x1   :  { %v4_v0 = vld [vmem:[%s22_s0] ss:$0 sm:$0xff] }
   0x2   :  { %5 = vst [vmem:[%s23_s1] sm:$0x3] %v4_v0 }

// kernel: tile.0
= control target key start
LH: loop header
LB: loop body
LE: loop exit
PB: predicated region body
PF: predicated region fallthrough
CT: control target
= control target key end

     0   :  { %s34_s8 = smov 125   ;;  %s35_s9 = smov 126   ;;  %vm7_vm0 = vcmask 7168   ;;  %s61_s0 = inlined_call_operand.vmem [shape: f32[2,4], index: 0, kind: input, shape index: {}]   ;;  %s62_s1 = inlined_call_operand.vmem [shape: f32[8,1], index: 1, kind: output, shape index: {}]  }
   0x1   :  { %v4_v0 = vld [vmem:[%s61_s0] sm:$0x3]  ;;  %s33_s0 = smov 127  }
   0x2   :  { %5 = vst [vmem:[#allocation0] sm:$0x3] %v4_v0 }
   0x9   :  { %v9_v1 = vld [vmem:[#allocation0] sm:$0x3]  }
   0xa   :  { %v21_v2 = vld [vmem:[#allocation0] sm:$0x3]   ;;  %10 = vrot.lane.b32.xlu0 %v9_v1, %s33_s0 }
   0xb   :  { %22 = vrot.lane.b32.xlu1 %v21_v2, %s34_s8  ;;  %v15_v3 = vld [vmem:[#allocation0] sm:$0x3]  }
   0xc   :  { %v6_v4 = vld [vmem:[#allocation0] sm:$0x3]  }
   0xd   :  { %8 = vst.msk [vmem:[%s62_s1] ss:$4 sm:$0x3] %vm7_vm0, %v6_v4  }
  0x12   :  { %16 = vrot.lane.b32.xlu0 %v15_v3, %s35_s9 }
  0x7c   :  { %v11_v5 = vpop.permute.xlu0 %10  }
  0x7d   :  { %v23_v6 = vpop.permute.xlu1 %22   ;;  %27 = vst.msk [vmem:[%s62_s1 + $0x1] ss:$4 sm:$0x3] %vm7_vm0, %v11_v5  }
  0x7e   :  { %29 = vst.msk [vmem:[%s62_s1 + $0x3] ss:$4 sm:$0x3] %vm7_vm0, %v23_v6  }
  0x84   :  { %v17_v7 = vpop.permute.xlu0 %16  }
  0x85   :  { %28 = vst.msk [vmem:[%s62_s1 + $0x2] ss:$4 sm:$0x3] %vm7_vm0, %v17_v7  }

// kernel: pool_bn_forward.3
= control target key start
LH: loop header
LB: loop body
LE: loop exit
PB: predicated region body
PF: predicated region fallthrough
CT: control target
= control target key end

     0   :  { %v40_v0 = vmov 0   ;;  %s79_s1 = inlined_call_operand.vmem [shape: f32[8,1], index: 1, kind: input, shape index: {}]   ;;  %s80_s2 = inlined_call_operand.vmem [shape: f32[8,1], index: 2, kind: input, shape index: {}]   ;;  %s81_s0 = inlined_call_operand.vmem [shape: f32[8,256], index: 0, kind: input, shape index: {}]   ;;  %s82_s3 = inlined_call_operand.vmem [shape: f32[8,256], index: 3, kind: output, shape index: {}]  }
   0x1   :  { %39 = vset.pattern.permute.xlu0 %v40_v0  ;;  %v16_v1 = vld [vmem:[%s79_s1] sm:$0xff]  ;;  %v15_v5 = vld [vmem:[%s81_s0 + $0x8] sm:$0xff] }
   0x2   :  { %19 = vperm.xlu0 %39, %v16_v1   ;;  %v24_v2 = vld [vmem:[%s80_s2] sm:$0xff] }
   0x3   :  { %v14_v4 = vld [vmem:[%s81_s0] sm:$0xff] }
   0xa   :  { %27 = vperm.xlu0 %39, %v24_v2  }
  0x74   :  { %v20_v3 = vpop.permute.xlu0 %19 }
  0x75   :  { %v22_v6 = vmul.f32 %v20_v3, %v14_v4  ;;  %v23_v7 = vmul.f32 %v20_v3, %v15_v5 }
  0x7c   :  { %v28_v8 = vpop.permute.xlu0 %27 }
  0x7d   :  { %v30_v9 = vadd.f32 %v28_v8, %v22_v6  ;;  %v31_v10 = vadd.f32 %v28_v8, %v23_v7 }
  0x7f   :  { %32 = vst [vmem:[%s82_s3] sm:$0xff] %v30_v9 }
  0x80   :  { %33 = vst [vmem:[%s82_s3 + $0x8] sm:$0xff] %v31_v10 }

// kernel: pool_bn_forward.2
= control target key start
LH: loop header
LB: loop body
LE: loop exit
PB: predicated region body
PF: predicated region fallthrough
CT: control target
= control target key end

     0   :  { %10 = vsyncpa [#allocation4], 0  ;;  %s1347_s0 = inlined_call_operand.vmem [shape: f32[16,16], index: 0, kind: input, shape index: {}]   ;;  %s1348_s1 = inlined_call_operand.hbm [shape: f32[2,4,16,16], index: 1, kind: input, shape index: {}]   ;;  %s1349_s2 = inlined_call_operand.vmem [shape: f32[2,4,16,16], index: 2, kind: output, shape index: {0}]   ;;  %s1350_s3 = inlined_call_operand.vmem [shape: f32[2,4,1,1], index: 3, kind: output, shape index: {1}]   ;;  %s1351_s4 = inlined_call_operand.vmem [shape: f32[2,4,1,1], index: 4, kind: output, shape index: {2}]  }
   0x1   :  { %12 = vsyncpa [#allocation4 + $0x1], 0  ;;  %s1083_s15 = smov 0   ;;  %s1085_s16 = smov 0  }
   0x2   :  { %s1087_s17 = smov 0   ;;  %s1089_s18 = smov 0  }
   0x3   :  { %s1091_s19 = smov 0   ;;  %s1093_s20 = smov 0  }
   0x4 LB: > { %s892_s21 = sadd.s32 4294967295, %s1050_s20   ;;  %s30_s22 = sadd.s32 1, %s1046_s19  ;;  %s1050_s20 = sphi %s1093_s20, %s18_s20   ;;  %s1046_s19 = sphi %s1091_s19, %s1358_s19   ;;  %s1042_s18 = sphi %s1089_s18, %s1357_s18   ;;  %s1038_s17 = sphi %s1087_s17, %s1356_s17   ;;  %s1034_s16 = sphi %s1085_s16, %s1355_s16   ;;  %s1030_s15 = sphi %s1083_s15, %s1354_s15  }
   0x5   : > { %p32_p0 = scmp.ge.s32.totalorder %s30_s22, 2  ;;  %s60_s23 = sadd.s32 1, %s1038_s17 }
   0x6   : > { %p67_p1 = scmp.ne.s32.totalorder %s1038_s17, %s1034_s16  ;;  %p68_p2 = scmp.eq.s32.totalorder %s1050_s20, 0 }
   0x7   : > { %s1360_s22 = smov (%p32_p0, %s30_s22), 0  ;;  %p73_p4 = scmp.ne.s32.totalorder %s1034_s16, %s1030_s15 }
   0x8   : > { %p1119_p3 = por %p68_p2, %p67_p1  ;;  %s55_s25 = ssub.s32 %s1046_s19, %s1360_s22 }
   0x9   : > { %p74_p5 = scmp.eq.s32.totalorder %s892_s21, 0  ;;  %p58_p6 = scmp.eq.s32.totalorder %s55_s25, 0 }
   0xa   : > { %p915_p8 = scmp.lt.s32.totalorder %s1050_s20, 2  ;;  %s184_s28 = sand.u32 1, %s1038_s17  }
   0xb   : > { %p1126_p7 = por %p74_p5, %p73_p4  ;;  %s907_s29 = sshll.u32 %s1046_s19, 6 }
   0xc   : > { %s1132_s27 = scalar_select %p58_p6, %s1038_s17, %s60_s23  }
   0xd   : > { %s896_s30 = sshll.u32 %s184_s28, 6  ;;  %s196_s7 = scalar_lea.hbm %s1348_s1, %s907_s29 }
   0xe   : > { %s197_s8 = sshll.u32 %s196_s7, 4  ;;  %s188_s9 = scalar_lea.vmem [#allocation3], %s896_s30  ;;  %s198_s8 = int_to_ptr.hbm [resolvable:$true] %s197_s8 }
   0xf   : > { %s199_s10 = sshll.u32 %s188_s9, 4  ;;  %p912_p9 = pnand %p915_p8, %p1119_p3  ;;  %s200_s10 = int_to_ptr.vmem [resolvable:$true] %s199_s10 }
  0x10   : > { %p899_p10 = scmp.ge.s32.totalorder %s1050_s20, 1  ;;  %p207_p11 = scmp.lt.s32.totalorder %s1050_s20, 3 }
  0x11   : > { %s185_s11 = scalar_lea.sflag [#allocation4], %s184_s28  ;;  %s1052_s12 = smov 128  }
  0x12   : > { %s1053_s13 = smov 8   ;;  %p208_p12 = pnand %p899_p10, %p207_p11 }
  0x13   : > { %914 = dma.hbm_to_vmem [thread:$0]  (!%p912_p9), %s198_s8, 1024, %s200_s10, %s185_s11, %s1052_s12, %s1052_s12, %s1053_s13  }
  0x14   : > { %211 = sbr.rel (%p208_p12) target bundleno = 499 (0x1f3), region = 28  ;;  %s213_s14 = sand.u32 (!%p208_p12), 1, %s1034_s16  }
  0x15   : > { %s900_s15 = sshll.u32 (!%p208_p12), %s213_s14, 6  ;;  %s214_s21 = scalar_lea.sflag (!%p208_p12), [#allocation4], %s213_s14 }
  0x16   : > { %s217_s23 = scalar_lea.vmem (!%p208_p12), [#allocation3], %s900_s15 }
  0x19   : > { %1025 = dma.done.wait (%p1126_p7), %s214_s21, 1024  }
  0x1a   : > { %1027 = vsyncadd (%p1126_p7), %s214_s21, 4294966272  ;;  %vm302_vm0 = vcmask 146432   ;;  %v1054_v0 = vmov 0.0   ;;  %v296_v1 = vld [vmem:[%s217_s23 + $0x10] sm:$0xff]  ;;  %v294_v2 = vld [vmem:[%s217_s23] sm:$0xff]  ;;  %s1055_s24 = smov 1  }
  0x1b   : > { %307 = vst.msk [vmem:[#allocation2 + $0x18] sm:$0xff] %vm302_vm0, %v1054_v0  ;;  %328 = vrot.lane.b32.xlu1 %v296_v1, %s1055_s24  ;;  %324 = vrot.lane.b32.xlu0 %v294_v2, %s1055_s24  ;;  %v298_v3 = vld [vmem:[%s217_s23 + $0x20] sm:$0xff]  ;;  %v297_v4 = vld [vmem:[%s217_s23 + $0x18] sm:$0xff]  ;;  %vm305_vm1 = vcmask 140288   ;;  %vm348_vm2 = vcmask 138248   ;;  %s1056_s25 = smov 127  }
  0x1c   : > { %308 = vst.msk [vmem:[#allocation2 + $0x20] sm:$0xff] %vm302_vm0, %v1054_v0  ;;  %332 = vrot.lane.b32.xlu2 %v298_v3, %s1055_s24  ;;  %v295_v5 = vld [vmem:[%s217_s23 + $0x8] sm:$0xff]  ;;  %v300_v7 = vld [vmem:[%s217_s23 + $0x30] sm:$0xff]  ;;  %v301_v8 = vld [vmem:[%s217_s23 + $0x38] sm:$0xff]  ;;  %s1057_s26 = smov 126   ;;  %p266_p13 = scmp.lt.s32.totalorder %s1042_s18, 1 }
  0x1d   : > { %303 = vst.msk [vmem:[#allocation2] sm:$0xff] %vm302_vm0, %v1054_v0  ;;  %v299_v6 = vld [vmem:[%s217_s23 + $0x28] sm:$0xff]  ;;  %vm489_vm3 = vcmask 1046528   ;;  %vm526_vm4 = vcmask 1045504   ;;  %vm573_vm5 = vcmask 130048   ;;  %vm694_vm6 = vcmask 0  }
  0x1e   : > { %304 = vst.msk [vmem:[#allocation2 + $0x8] sm:$0xff] %vm302_vm0, %v1054_v0  ;;  %s1362_s18 = smov (!%p266_p13, %s1042_s18), 1  ;;  %v1216_v3 = vld [vmem:[%s1347_s0 + $0x8] sm:$0xff] }
  0x1f   : > { %310 = vst.msk [vmem:[#allocation2 + $0x30] sm:$0xff] %vm302_vm0, %v1054_v0  ;;  %s908_s28 = sshll.u32 %s1362_s18, 6  ;;  %s903_s10 = sshll.u32 %s1362_s18, 2 }
  0x20   : > { %311 = vst.msk [vmem:[#allocation2 + $0x38] sm:$0xff] %vm302_vm0, %v1054_v0  ;;  %s1227_s9 = scalar_lea.vmem %s1349_s2, %s908_s28  ;;  %s1310_s13 = scalar_lea.vmem %s1350_s3, %s903_s10 }
  0x21   : > { %313 = vst.msk [vmem:[#allocation2 + $0x48] sm:$0xff] %vm302_vm0, %v1054_v0  ;;  %s292_s21 = scalar_lea.vmem %s1351_s4, %s903_s10 }
  0x22   : > { %314 = vst.msk [vmem:[#allocation2 + $0x50] sm:$0xff] %vm302_vm0, %v1054_v0 }
  0x23   : > { %330 = vrot.lane.b32.xlu1 %v297_v4, %s1055_s24  ;;  %326 = vrot.lane.b32.xlu0 %v295_v5, %s1055_s24  ;;  %309 = vst.msk [vmem:[#allocation2 + $0x28] sm:$0x3] %vm305_vm1, %v1054_v0  ;;  %v1222_v5 = vld [vmem:[%s1347_s0] sm:$0xff] }
  0x24   : > { %334 = vrot.lane.b32.xlu2 %v299_v6, %s1055_s24  ;;  %306 = vst.msk [vmem:[#allocation2 + $0x10] sm:$0x3] %vm305_vm1, %v1054_v0 }
  0x25   : > { %312 = vst.msk [vmem:[#allocation2 + $0x40] sm:$0x3] %vm305_vm1, %v1054_v0 }
  0x26   : > { %315 = vst.msk [vmem:[#allocation2 + $0x58] sm:$0x3] %vm305_vm1, %v1054_v0 }
  0x2b   : > { %336 = vrot.lane.b32.xlu0 %v300_v7, %s1055_s24  ;;  %338 = vrot.lane.b32.xlu1 %v301_v8, %s1055_s24 }
  0x76   : > { %v333_v9 = vpop.permute.xlu2 %332 }
  0x77   : > { %353 = vst.msk [vmem:[#allocation2 + $0x31] sm:$0xff] %vm348_vm2, %v333_v9 }
  0x7e   : > { %v335_v10 = vpop.permute.xlu2 %334  ;;  %v1159_v21 = vld [vmem:[#allocation2 + $0x30] sm:$0xff] }
  0x7f   : > { %354 = vst.msk [vmem:[#allocation2 + $0x39] sm:$0xff] %vm348_vm2, %v335_v10 }
  0x86   : > { %v1168_v24 = vld [vmem:[#allocation2 + $0x40] sm:$0x3]  ;;  %v1173_v26 = vld [vmem:[#allocation2 + $0x38] sm:$0xff] }
  0x8d   : > { %v329_v11 = vpop.permute.xlu1 %328  ;;  %v325_v12 = vpop.permute.xlu0 %324 }
  0x8e   : > { %351 = vst.msk [vmem:[#allocation2 + $0x19] sm:$0xff] %vm348_vm2, %v329_v11 }
  0x8f   : > { %349 = vst.msk [vmem:[#allocation2 + $0x1] sm:$0xff] %vm348_vm2, %v325_v12 }
  0x95   : > { %v331_v13 = vpop.permute.xlu1 %330  ;;  %v327_v14 = vpop.permute.xlu0 %326  ;;  %v1154_v16 = vld [vmem:[#allocation2 + $0x18] sm:$0xff] }
  0x96   : > { %352 = vst.msk [vmem:[#allocation2 + $0x21] sm:$0xff] %vm348_vm2, %v331_v13  ;;  %v357_v15 = vld [vmem:[#allocation2] sm:$0xff] }
  0x97   : > { %350 = vst.msk [vmem:[#allocation2 + $0x9] sm:$0xff] %vm348_vm2, %v327_v14  ;;  %381 = vrot.lane.b32.xlu2 %v357_v15, %s1056_s25 }
  0x9d   : > { %v337_v17 = vpop.permute.xlu0 %336  ;;  %v339_v18 = vpop.permute.xlu1 %338  ;;  %v1161_v22 = vld [vmem:[#allocation2 + $0x28] sm:$0x3]  ;;  %v1165_v23 = vld [vmem:[#allocation2 + $0x20] sm:$0xff] }
  0x9e   : > { %v359_v19 = vld [vmem:[#allocation2 + $0x10] sm:$0x3]  ;;  %v358_v20 = vld [vmem:[#allocation2 + $0x8] sm:$0xff]  ;;  %355 = vst.msk [vmem:[#allocation2 + $0x49] sm:$0xff] %vm348_vm2, %v337_v17 }
  0x9f   : > { %387 = vrot.lane.b32.xlu2 %v1154_v16, %s1056_s25  ;;  %385 = vrot.lane.b32.xlu1 %v359_v19, %s1056_s25  ;;  %356 = vst.msk [vmem:[#allocation2 + $0x51] sm:$0xff] %vm348_vm2, %v339_v18 }
  0xa0   : > { %383 = vrot.lane.b32.xlu0 %v358_v20, %s1056_s25 }
  0xa5   : > { %v1170_v25 = vld [vmem:[#allocation2 + $0x48] sm:$0xff] }
  0xa6   : > { %v1177_v27 = vld [vmem:[#allocation2 + $0x58] sm:$0x3]  ;;  %v1179_v28 = vld [vmem:[#allocation2 + $0x50] sm:$0xff] }
  0xa7   : > { %393 = vrot.lane.b32.xlu2 %v1159_v21, %s1056_s25  ;;  %391 = vrot.lane.b32.xlu1 %v1161_v22, %s1056_s25 }
  0xa8   : > { %389 = vrot.lane.b32.xlu0 %v1165_v23, %s1056_s25 }
  0xaf   : > { %397 = vrot.lane.b32.xlu1 %v1168_v24, %s1056_s25  ;;  %399 = vrot.lane.b32.xlu2 %v1170_v25, %s1056_s25 }
  0xb0   : > { %395 = vrot.lane.b32.xlu0 %v1173_v26, %s1056_s25 }
  0xb7   : > { %403 = vrot.lane.b32.xlu1 %v1177_v27, %s1056_s25  ;;  %429 = vrot.lane.b32.xlu2 %v357_v15, %s1057_s26 }
  0xb8   : > { %401 = vrot.lane.b32.xlu0 %v1179_v28, %s1056_s25 }
  0xbf   : > { %433 = vrot.lane.b32.xlu1 %v359_v19, %s1057_s26  ;;  %435 = vrot.lane.b32.xlu2 %v1154_v16, %s1057_s26 }
  0xc0   : > { %431 = vrot.lane.b32.xlu0 %v358_v20, %s1057_s26 }
  0xc7   : > { %439 = vrot.lane.b32.xlu1 %v1161_v22, %s1057_s26  ;;  %441 = vrot.lane.b32.xlu2 %v1159_v21, %s1057_s26 }
  0xc8   : > { %437 = vrot.lane.b32.xlu0 %v1165_v23, %s1057_s26 }
  0xcf   : > { %445 = vrot.lane.b32.xlu1 %v1168_v24, %s1057_s26  ;;  %447 = vrot.lane.b32.xlu2 %v1170_v25, %s1057_s26 }
  0xd0   : > { %443 = vrot.lane.b32.xlu0 %v1173_v26, %s1057_s26 }
  0xd7   : > { %451 = vrot.lane.b32.xlu1 %v1177_v27, %s1057_s26 }
  0xd8   : > { %449 = vrot.lane.b32.xlu0 %v1179_v28, %s1057_s26 }
  0xf1   : > { %v382_v29 = vpop.permute.xlu2 %381 }
  0xf2   : > { %v417_v42 = vadd.f32 %v382_v29, %v357_v15 }
  0xf9   : > { %v388_v30 = vpop.permute.xlu2 %387 }
  0xfa   : > { %v420_v56 = vadd.f32 %v388_v30, %v1154_v16 }
 0x101   : > { %v394_v33 = vpop.permute.xlu2 %393 }
 0x109   : > { %v1192_v36 = vpop.permute.xlu2 %399 }
 0x111   : > { %v386_v31 = vpop.permute.xlu1 %385  ;;  %v430_v39 = vpop.permute.xlu2 %429 }
 0x112   : > { %v384_v32 = vpop.permute.xlu0 %383  ;;  %v419_v43 = vadd.f32 %v386_v31, %v359_v19  ;;  %v465_v44 = vadd.f32 %v430_v39, %v417_v42  ;;  %v423_v19 = vadd.f32 %v394_v33, %v1159_v21 }
 0x113   : > { %v418_v45 = vadd.f32 %v384_v32, %v358_v20 }
 0x114   : > { %v490_v52 = vrot.slane %v465_v44, 1  ;;  %v527_v57 = vrot.slane %v465_v44, 2 }
 0x119   : > { %v392_v34 = vpop.permute.xlu1 %391  ;;  %v436_v47 = vpop.permute.xlu2 %435 }
 0x11a   : > { %v390_v35 = vpop.permute.xlu0 %389  ;;  %v422_v60 = vadd.f32 %v392_v34, %v1161_v22  ;;  %v468_v63 = vadd.f32 %v436_v47, %v420_v56 }
 0x11b   : > { %v421_v0 = vadd.f32 %v390_v35, %v1165_v23 }
 0x11c   : > { %v495_v15 = vrot.slane %v468_v63, 1  ;;  %v532_v23 = vrot.slane %v468_v63, 2 }
 0x121   : > { %v1194_v37 = vpop.permute.xlu1 %397  ;;  %v442_v11 = vpop.permute.xlu2 %441 }
 0x122   : > { %v1196_v38 = vpop.permute.xlu0 %395  ;;  %v425_v21 = vadd.f32 %v1194_v37, %v1168_v24  ;;  %v471_v33 = vadd.f32 %v442_v11, %v423_v19 }
 0x123   : > { %v424_v34 = vadd.f32 %v1196_v38, %v1173_v26 }
 0x129   : > { %v1198_v40 = vpop.permute.xlu1 %403 }
 0x12a   : > { %v1200_v41 = vpop.permute.xlu0 %401 }
 0x131   : > { %v434_v46 = vpop.permute.xlu1 %433 }
 0x132   : > { %v467_v48 = vadd.f32 %v434_v46, %v419_v43  ;;  %v432_v49 = vpop.permute.xlu0 %431 }
 0x133   : > { %v466_v50 = vadd.f32 %v432_v49, %v418_v45  ;;  %v500_v49 = vrot.slane %v471_v33, 1 }
 0x134   : > { %v493_v51 = vrot.slane %v467_v48, 1  ;;  %v530_v53 = vrot.slane %v467_v48, 2 }
 0x135   : > { %v491_v54 = vrot.slane %v466_v50, 1  ;;  %v528_v55 = vrot.slane %v466_v50, 2 }
 0x137   : > { %v492_v58 = vsel %vm489_vm3, %v490_v52, %v491_v54  ;;  %v494_v59 = vsel %vm489_vm3, %v491_v54, %v493_v51  ;;  %v531_v2 = vsel %vm526_vm4, %v528_v55, %v530_v53  ;;  %v529_v4 = vsel %vm526_vm4, %v527_v57, %v528_v55  ;;  %v448_v52 = vpop.permute.xlu2 %447 }
 0x138   : > { %v519_v61 = vadd.f32 %v494_v59, %v466_v50  ;;  %v518_v62 = vadd.f32 %v492_v58, %v465_v44  ;;  %v426_v51 = vadd.f32 %v1192_v36, %v1170_v25  ;;  %v537_v55 = vrot.slane %v471_v33, 2 }
 0x139   : > { %v440_v1 = vpop.permute.xlu1 %439  ;;  %v428_v58 = vadd.f32 %v1198_v40, %v1177_v27 }
 0x13a   : > { %v470_v6 = vadd.f32 %v440_v1, %v422_v60  ;;  %v438_v7 = vpop.permute.xlu0 %437  ;;  %v556_v8 = vadd.f32 %v531_v2, %v519_v61  ;;  %v555_v9 = vadd.f32 %v529_v4, %v518_v62  ;;  %v474_v59 = vadd.f32 %v448_v52, %v426_v51 }
 0x13b   : > { %v469_v10 = vadd.f32 %v438_v7, %v421_v0  ;;  %v427_v60 = vadd.f32 %v1200_v41, %v1179_v28 }
 0x13c   : > { %v498_v12 = vrot.slane %v470_v6, 1  ;;  %v1230_v13 = vmul.f32 %v1216_v3, %v556_v8  ;;  %v1233_v14 = vmul.f32 %v1222_v5, %v555_v9  ;;  %v535_v16 = vrot.slane %v470_v6, 2 }
 0x13d   : > { %v496_v17 = vrot.slane %v469_v10, 1  ;;  %v533_v18 = vrot.slane %v469_v10, 2  ;;  %v505_v8 = vrot.slane %v474_v59, 1 }
 0x13e   : > { %v585_v20 = vsel %vm573_vm5, %v1230_v13, 0.0  ;;  %575 = vst.msk [vmem:[%s1227_s9 + $0x8] sm:$0xff] %vm573_vm5, %v1230_v13  ;;  %v582_v22 = vsel %vm573_vm5, %v1233_v14, 0.0 }
 0x13f   : > { %v497_v29 = vsel %vm489_vm3, %v495_v15, %v496_v17  ;;  %v499_v30 = vsel %vm489_vm3, %v496_v17, %v498_v12  ;;  %586 = vadd.xlane.f32.xlu0 %v585_v20  ;;  %583 = vadd.xlane.f32.xlu2 %v582_v22  ;;  %574 = vst.msk [vmem:[%s1227_s9] sm:$0xff] %vm573_vm5, %v1233_v14  ;;  %v542_v12 = vrot.slane %v474_v59, 2 }
 0x140   : > { %v521_v31 = vadd.f32 %v499_v30, %v469_v10  ;;  %v520_v32 = vadd.f32 %v497_v29, %v468_v63  ;;  %v536_v39 = vsel %vm526_vm4, %v533_v18, %v535_v16  ;;  %v534_v42 = vsel %vm526_vm4, %v532_v23, %v533_v18 }
 0x141   : > { %v446_v35 = vpop.permute.xlu1 %445  ;;  %v634_v22 = vmul.f32 %v1233_v14, %v1233_v14 }
 0x142   : > { %v473_v43 = vadd.f32 %v446_v35, %v425_v21  ;;  %v444_v44 = vpop.permute.xlu0 %443  ;;  %v558_v45 = vadd.f32 %v536_v39, %v521_v31  ;;  %v557_v46 = vadd.f32 %v534_v42, %v520_v32 }
 0x143   : > { %v472_v47 = vadd.f32 %v444_v44, %v424_v34  ;;  %v642_v31 = vsel %vm573_vm5, %v634_v22, 0.0 }
 0x144   : > { %v503_v48 = vrot.slane %v473_v43, 1  ;;  %v568_v24 = vmul.f32 %v1216_v3, %v558_v45  ;;  %v567_v37 = vmul.f32 %v1222_v5, %v557_v46  ;;  %v540_v50 = vrot.slane %v473_v43, 2 }
 0x145   : > { %v501_v26 = vrot.slane %v472_v47, 1  ;;  %v538_v38 = vrot.slane %v472_v47, 2 }
 0x146   : > { %v591_v53 = vsel %vm573_vm5, %v568_v24, 0.0  ;;  %577 = vst.msk [vmem:[%s1227_s9 + $0x18] sm:$0xff] %vm573_vm5, %v568_v24  ;;  %v588_v54 = vsel %vm573_vm5, %v567_v37, 0.0  ;;  %v637_v14 = vmul.f32 %v568_v24, %v568_v24  ;;  %v636_v34 = vmul.f32 %v567_v37, %v567_v37 }
 0x147   : > { %v502_v56 = vsel %vm489_vm3, %v500_v49, %v501_v26  ;;  %v504_v57 = vsel %vm489_vm3, %v501_v26, %v503_v48  ;;  %592 = vadd.xlane.f32.xlu2 %v591_v53  ;;  %589 = vadd.xlane.f32.xlu1 %v588_v54  ;;  %576 = vst.msk [vmem:[%s1227_s9 + $0x10] sm:$0xff] %vm573_vm5, %v567_v37 }
 0x148   : > { %v523_v25 = vadd.f32 %v504_v57, %v472_v47  ;;  %v522_v36 = vadd.f32 %v502_v56, %v471_v33  ;;  %v541_v62 = vsel %vm526_vm4, %v538_v38, %v540_v50  ;;  %v539_v63 = vsel %vm526_vm4, %v537_v55, %v538_v38 }
 0x149   : > { %v452_v61 = vpop.permute.xlu1 %451  ;;  %v648_v35 = vsel %vm573_vm5, %v636_v34, 0.0 }
 0x14a   : > { %v476_v0 = vadd.f32 %v452_v61, %v428_v58  ;;  %v450_v1 = vpop.permute.xlu0 %449  ;;  %v560_v2 = vadd.f32 %v541_v62, %v523_v25  ;;  %v559_v4 = vadd.f32 %v539_v63, %v522_v36 }
 0x14b   : > { %v475_v6 = vadd.f32 %v450_v1, %v427_v60 }
 0x14c   : > { %v508_v7 = vrot.slane %v476_v0, 1  ;;  %v570_v27 = vmul.f32 %v1216_v3, %v560_v2  ;;  %v569_v40 = vmul.f32 %v1222_v5, %v559_v4  ;;  %v545_v9 = vrot.slane %v476_v0, 2 }
 0x14d   : > { %v506_v28 = vrot.slane %v475_v6, 1  ;;  %v543_v41 = vrot.slane %v475_v6, 2 }
 0x14e   : > { %v597_v10 = vsel %vm573_vm5, %v570_v27, 0.0  ;;  %579 = vst.msk [vmem:[%s1227_s9 + $0x28] sm:$0xff] %vm573_vm5, %v570_v27  ;;  %v594_v11 = vsel %vm573_vm5, %v569_v40, 0.0  ;;  %v639_v42 = vmul.f32 %v570_v27, %v570_v27  ;;  %v638_v44 = vmul.f32 %v569_v40, %v569_v40 }
 0x14f   : > { %v507_v15 = vsel %vm489_vm3, %v505_v8, %v506_v28  ;;  %v509_v16 = vsel %vm489_vm3, %v506_v28, %v508_v7  ;;  %598 = vadd.xlane.f32.xlu0 %v597_v10  ;;  %595 = vadd.xlane.f32.xlu2 %v594_v11  ;;  %578 = vst.msk [vmem:[%s1227_s9 + $0x20] sm:$0xff] %vm573_vm5, %v569_v40 }
 0x150   : > { %v525_v17 = vadd.f32 %v509_v16, %v475_v6  ;;  %v524_v18 = vadd.f32 %v507_v15, %v474_v59  ;;  %v546_v19 = vsel %vm526_vm4, %v543_v41, %v545_v9  ;;  %v544_v20 = vsel %vm526_vm4, %v542_v12, %v543_v41 }
 0x151   : > { %v657_v45 = vsel %vm573_vm5, %v639_v42, 0.0 }
 0x152   : > { %v562_v23 = vadd.f32 %v546_v19, %v525_v17  ;;  %v561_v29 = vadd.f32 %v544_v20, %v524_v18 }
 0x154   : > { %v572_v30 = vmul.f32 %v1216_v3, %v562_v23  ;;  %v571_v21 = vmul.f32 %v1222_v5, %v561_v29  ;;  %v635_v3 = vmul.f32 %v1230_v13, %v1230_v13  ;;  %v651_v5 = vsel %vm573_vm5, %v637_v14, 0.0 }
 0x155   : > { %v654_v13 = vsel %vm573_vm5, %v638_v44, 0.0 }
 0x156   : > { %v603_v32 = vsel %vm573_vm5, %v572_v30, 0.0  ;;  %581 = vst.msk [vmem:[%s1227_s9 + $0x38] sm:$0xff] %vm573_vm5, %v572_v30  ;;  %v600_v33 = vsel %vm573_vm5, %v571_v21, 0.0  ;;  %v645_v39 = vsel %vm573_vm5, %v635_v3, 0.0  ;;  %v640_v43 = vmul.f32 %v571_v21, %v571_v21 }
 0x157   : > { %643 = vadd.xlane.f32.xlu0 %v642_v31  ;;  %604 = vadd.xlane.f32.xlu2 %v603_v32  ;;  %580 = vst.msk [vmem:[%s1227_s9 + $0x30] sm:$0xff] %vm573_vm5, %v571_v21  ;;  %v641_v47 = vmul.f32 %v572_v30, %v572_v30 }
 0x158   : > { %601 = vadd.xlane.f32.xlu1 %v600_v33  ;;  %v660_v46 = vsel %vm573_vm5, %v640_v43, 0.0 }
 0x159   : > { %v663_v48 = vsel %vm573_vm5, %v641_v47, 0.0 }
 0x15f   : > { %652 = vadd.xlane.f32.xlu0 %v651_v5  ;;  %649 = vadd.xlane.f32.xlu2 %v648_v35 }
 0x160   : > { %646 = vadd.xlane.f32.xlu1 %v645_v39 }
 0x167   : > { %658 = vadd.xlane.f32.xlu2 %v657_v45  ;;  %661 = vadd.xlane.f32.xlu0 %v660_v46 }
 0x168   : > { %655 = vadd.xlane.f32.xlu1 %v654_v13 }
 0x170   : > { %664 = vadd.xlane.f32.xlu1 %v663_v48 }
 0x1b2   : > { %v584_v24 = vpop.xlane.xlu2 %583  ;;  %v587_v37 = vpop.xlane.xlu0 %586 }
 0x1b3   : > { %v606_v49 = vadd.f32 %v587_v37, %v584_v24 }
 0x1b5   : > { %v607_v50 = vrot.slane %v606_v49, 4 }
 0x1b7   : > { %v608_v26 = vadd.f32 %v607_v50, %v606_v49 }
 0x1b9   : > { %v609_v38 = vrot.slane %v608_v26, 2 }
 0x1ba   : > { %v593_v51 = vpop.xlane.xlu2 %592  ;;  %v590_v52 = vpop.xlane.xlu1 %589 }
 0x1bb   : > { %v610_v53 = vadd.f32 %v609_v38, %v608_v26  ;;  %v613_v54 = vadd.f32 %v593_v51, %v590_v52 }
 0x1bd   : > { %v611_v55 = vrot.slane %v610_v53, 1  ;;  %v614_v56 = vrot.slane %v613_v54, 4 }
 0x1bf   : > { %v612_v57 = vadd.f32 %v611_v55, %v610_v53  ;;  %v615_v58 = vadd.f32 %v614_v56, %v613_v54 }
 0x1c1   : > { %695 = vst.msk [vmem:[%s1310_s13] sm:$0x1] %vm694_vm6, %v612_v57  ;;  %v616_v25 = vrot.slane %v615_v58, 2 }
 0x1c2   : > { %v596_v36 = vpop.xlane.xlu2 %595  ;;  %v599_v59 = vpop.xlane.xlu0 %598 }
 0x1c3   : > { %v617_v60 = vadd.f32 %v616_v25, %v615_v58  ;;  %v620_v61 = vadd.f32 %v599_v59, %v596_v36 }
 0x1c5   : > { %v618_v62 = vrot.slane %v617_v60, 1  ;;  %v621_v63 = vrot.slane %v620_v61, 4 }
 0x1c7   : > { %v619_v0 = vadd.f32 %v618_v62, %v617_v60  ;;  %v622_v1 = vadd.f32 %v621_v63, %v620_v61 }
 0x1c9   : > { %696 = vst.msk [vmem:[%s1310_s13 + $0x1] sm:$0x1] %vm694_vm6, %v619_v0  ;;  %v623_v2 = vrot.slane %v622_v1, 2 }
 0x1ca   : > { %v605_v4 = vpop.xlane.xlu2 %604  ;;  %v644_v6 = vpop.xlane.xlu0 %643 }
 0x1cb   : > { %v624_v7 = vadd.f32 %v623_v2, %v622_v1  ;;  %v602_v27 = vpop.xlane.xlu1 %601 }
 0x1cc   : > { %v627_v40 = vadd.f32 %v605_v4, %v602_v27 }
 0x1cd   : > { %v625_v8 = vrot.slane %v624_v7, 1 }
 0x1ce   : > { %v628_v9 = vrot.slane %v627_v40, 4 }
 0x1cf   : > { %v626_v28 = vadd.f32 %v625_v8, %v624_v7 }
 0x1d0   : > { %v629_v41 = vadd.f32 %v628_v9, %v627_v40 }
 0x1d1   : > { %697 = vst.msk [vmem:[%s1310_s13 + $0x2] sm:$0x1] %vm694_vm6, %v626_v28 }
 0x1d2   : > { %v630_v10 = vrot.slane %v629_v41, 2  ;;  %v650_v11 = vpop.xlane.xlu2 %649  ;;  %v653_v12 = vpop.xlane.xlu0 %652 }
 0x1d3   : > { %v647_v15 = vpop.xlane.xlu1 %646  ;;  %v673_v16 = vadd.f32 %v653_v12, %v650_v11 }
 0x1d4   : > { %v631_v17 = vadd.f32 %v630_v10, %v629_v41  ;;  %v666_v18 = vadd.f32 %v647_v15, %v644_v6 }
 0x1d5   : > { %v674_v19 = vrot.slane %v673_v16, 4 }
 0x1d6   : > { %v632_v20 = vrot.slane %v631_v17, 1  ;;  %v667_v22 = vrot.slane %v666_v18, 4 }
 0x1d7   : > { %v675_v23 = vadd.f32 %v674_v19, %v673_v16 }
 0x1d8   : > { %v633_v29 = vadd.f32 %v632_v20, %v631_v17  ;;  %v668_v30 = vadd.f32 %v667_v22, %v666_v18 }
 0x1d9   : > { %v676_v21 = vrot.slane %v675_v23, 2 }
 0x1da   : > { %698 = vst.msk [vmem:[%s1310_s13 + $0x3] sm:$0x1] %vm694_vm6, %v633_v29  ;;  %v669_v31 = vrot.slane %v668_v30, 2  ;;  %v659_v32 = vpop.xlane.xlu2 %658  ;;  %v662_v46 = vpop.xlane.xlu0 %661 }
 0x1db   : > { %v677_v33 = vadd.f32 %v676_v21, %v675_v23  ;;  %v656_v14 = vpop.xlane.xlu1 %655 }
 0x1dc   : > { %v670_v34 = vadd.f32 %v669_v31, %v668_v30  ;;  %v680_v3 = vadd.f32 %v659_v32, %v656_v14 }
 0x1dd   : > { %v678_v5 = vrot.slane %v677_v33, 1 }
 0x1de   : > { %v671_v35 = vrot.slane %v670_v34, 1  ;;  %v681_v39 = vrot.slane %v680_v3, 4 }
 0x1df   : > { %v679_v42 = vadd.f32 %v678_v5, %v677_v33 }
 0x1e0   : > { %v672_v43 = vadd.f32 %v671_v35, %v670_v34  ;;  %v682_v44 = vadd.f32 %v681_v39, %v680_v3 }
 0x1e1   : > { %700 = vst.msk [vmem:[%s292_s21 + $0x1] sm:$0x1] %vm694_vm6, %v679_v42 }
 0x1e2   : > { %699 = vst.msk [vmem:[%s292_s21] sm:$0x1] %vm694_vm6, %v672_v43  ;;  %v683_v45 = vrot.slane %v682_v44, 2 }
 0x1e3   : > { %v665_v13 = vpop.xlane.xlu1 %664 }
 0x1e4   : > { %v684_v47 = vadd.f32 %v683_v45, %v682_v44  ;;  %v687_v48 = vadd.f32 %v665_v13, %v662_v46 }
 0x1e6   : > { %v685_v24 = vrot.slane %v684_v47, 1  ;;  %v688_v37 = vrot.slane %v687_v48, 4 }
 0x1e8   : > { %v686_v49 = vadd.f32 %v685_v24, %v684_v47  ;;  %v689_v50 = vadd.f32 %v688_v37, %v687_v48 }
 0x1ea   : > { %701 = vst.msk [vmem:[%s292_s21 + $0x2] sm:$0x1] %vm694_vm6, %v686_v49  ;;  %v690_v26 = vrot.slane %v689_v50, 2 }
 0x1ec   : > { %v691_v38 = vadd.f32 %v690_v26, %v689_v50 }
 0x1ee   : > { %v692_v51 = vrot.slane %v691_v38, 1 }
 0x1f0   : > { %v693_v52 = vadd.f32 %v692_v51, %v691_v38 }
 0x1f2   : > { %702 = vst.msk [vmem:[%s292_s21 + $0x3] sm:$0x1] %vm694_vm6, %v693_v52 }
 0x1f3 PF: > { %s18_s20 = sadd.s32 1, %s1050_s20   ;;  %s1354_s15 = smov %s1034_s16 }
 0x1f4   : > { %p15_p0 = scmp.ge.s32.totalorder %s18_s20, 4   ;;  %s1355_s16 = smov %s1038_s17 }
 0x1f5   : > { %s1356_s17 = smov %s1132_s27  ;;  %s1357_s18 = smov %s1046_s19 }
 0x1f6   : > { %s1358_s19 = smov %s1360_s22  ;;  %17 = sbr.rel (!%p15_p0) target bundleno = 4 (0x4), region = 92 }
 0x1fb   :  { %781 = vsyncpa [#allocation4], 1 }
 0x1fc   :  { %783 = vsyncpa [#allocation4 + $0x1], 1 }

</bundles_post_ra>
